<compile_context>
chip_gen: v7x
topology: tpu7x:2x2x1
jax: 0.10.0
libtpu: 0.0.40
codegen_flags: <defaults>
</compile_context>

<pallas_src>
import math
from functools import partial

import jax
import jax.numpy as jnp
from jax.experimental import pallas as pl
from jax.experimental.pallas import tpu as pltpu


def _round_up(n: int, m: int) -> int:
    return ((n + m - 1) // m) * m


def _cdiv(a: int, b: int) -> int:
    return (a + b - 1) // b


# ---------------------------------------------------------------------------
# Kernels
# ---------------------------------------------------------------------------

def _pos_emb_kernel_dxb(x_ref, freq_ref, out_ref, *, half_dim: int):
    """Transposed layout: batch on the lane axis (lane-dense for any dim).

    x_ref:    (1, TB)        f32  dense row of timesteps
    freq_ref: (half_dim, 1)  f32  frequency column, resident across the grid
    out_ref:  (dim, TB)           [sin; cos] stacked along the sublane axis
    """
    emb = freq_ref[...] * x_ref[...]                               # (half_dim, TB)
    out_ref[:half_dim, :] = jnp.sin(emb).astype(out_ref.dtype)     # EUP + vst
    out_ref[half_dim:, :] = jnp.cos(emb).astype(out_ref.dtype)     # EUP + vst


def _pos_emb_kernel_bxd(x_ref, freq_ref, out_ref, *, half_dim: int):
    """Row-major layout (only used when half_dim % 128 == 0 -> lane-dense).

    x_ref: (TB, 1), freq_ref: (1, half_dim), out_ref: (TB, dim)
    """
    emb = x_ref[...] * freq_ref[...]                               # (TB, half_dim)
    out_ref[:, :half_dim] = jnp.sin(emb).astype(out_ref.dtype)
    out_ref[:, half_dim:] = jnp.cos(emb).astype(out_ref.dtype)


# ---------------------------------------------------------------------------
# Wrapper
# ---------------------------------------------------------------------------

def _choose_batch_tile(B, bytes_per_batch_elem, align, max_tile, vmem_budget):
    """Pick the batch-tile size: big (amortize ~0.35us/step), multiple of
    `align`, >=2 grid steps when there is enough work (v7x megacore), and
    double-buffered tiles fit the VMEM budget (v7x has only 64 MiB)."""
    tb = min(_round_up(max_tile, align), _round_up(B, align))
    if B >= 2 * align and _cdiv(B, tb) < 2:
        tb = _round_up(_cdiv(B, 2), align)
    while tb > align and 2 * tb * bytes_per_batch_elem > vmem_budget:
        tb = _round_up(tb // 2, align)
    return tb


def sinusoidal_pos_emb(
    x: jax.Array,
    dim: int,
    *,
    out_dtype=jnp.float32,          # use jnp.bfloat16 for bf16 consumers (halves HBM writeback)
    max_tile: int = 2048,
    transposed_output: bool = False,  # return (dim, B) slab, skip the wrapper transpose
    vmem_budget: int = 24 * 1024 * 1024,
) -> jax.Array:
    """Pallas equivalent of SinusoidalPosEmb(dim).forward(x)."""
    assert x.ndim == 1, "x is a 1-D batch of scalars"
    assert dim % 2 == 0, "dim must be even (PyTorch module implicitly assumes this)"
    assert dim >= 4, "dim >= 4 required (dim == 2 divides by zero in the scale)"

    B = x.shape[0]
    half_dim = dim // 2
    scale = math.log(10000.0) / (half_dim - 1)
    out_itemsize = jnp.dtype(out_dtype).itemsize
    xf = x.astype(jnp.float32)

    def _compiler_params():
        return pltpu.CompilerParams(
            dimension_semantics=("parallel",),        # shard batch tiles across TCs (v7x)
            vmem_limit_bytes=32 * 1024 * 1024,        # explicit cap, safe on all generations
        )

    cost = pl.CostEstimate(
        flops=B * half_dim,                           # the outer-product multiply
        transcendentals=B * dim,                      # sin + cos per element
        bytes_accessed=4 * (B + half_dim) + out_itemsize * B * dim,
    )

    # ---- Fast row-major path: half_dim is lane-aligned, so both the sin and
    #      cos stores start on 128-lane boundaries and the output is already
    #      lane-dense -> no transpose needed anywhere.
    if (not transposed_output) and half_dim % 128 == 0:
        freq = jnp.exp(
            jnp.arange(half_dim, dtype=jnp.float32) * (-scale)
        ).reshape(1, half_dim)
        TB = _choose_batch_tile(
            B, dim * out_itemsize + 128 * 4, 8, max_tile, vmem_budget)
        grid = (_cdiv(B, TB),)
        return pl.pallas_call(
            partial(_pos_emb_kernel_bxd, half_dim=half_dim),
            out_shape=jax.ShapeDtypeStruct((B, dim), out_dtype),
            grid_spec=pltpu.PrefetchScalarGridSpec(
                num_scalar_prefetch=0,
                grid=grid,
                in_specs=[
                    pl.BlockSpec((TB, 1), lambda i: (i, 0)),          # batch tile
                    pl.BlockSpec((1, half_dim), lambda i: (0, 0)),    # freq (resident)
                ],
                out_specs=pl.BlockSpec((TB, dim), lambda i: (i, 0)),
            ),
            compiler_params=_compiler_params(),
            cost_estimate=cost,
        )(xf.reshape(B, 1), freq)

    # ---- General path: transposed (dim, B) layout, batch on the lane axis.
    freq = jnp.exp(
        jnp.arange(half_dim, dtype=jnp.float32) * (-scale)
    ).reshape(half_dim, 1)
    TB = _choose_batch_tile(
        B, _round_up(dim, 8) * out_itemsize + 8 * 4, 128, max_tile, vmem_budget)
    grid = (_cdiv(B, TB),)

    out_t = pl.pallas_call(
        partial(_pos_emb_kernel_dxb, half_dim=half_dim),
        out_shape=jax.ShapeDtypeStruct((dim, B), out_dtype),
        grid_spec=pltpu.PrefetchScalarGridSpec(
            num_scalar_prefetch=0,
            grid=grid,
            in_specs=[
                pl.BlockSpec((1, TB), lambda i: (0, i)),              # batch tile (dense row)
                pl.BlockSpec((half_dim, 1), lambda i: (0, 0)),        # freq column (resident)
            ],
            out_specs=pl.BlockSpec((dim, TB), lambda i: (0, i)),
        ),
        compiler_params=_compiler_params(),
        cost_estimate=cost,
    )(xf.reshape(1, B), freq)

    if transposed_output:
        return out_t                                   # (dim, B), hand directly to consumer
    # TODO(synk): prefer transposed_output=True (or full fusion into the first
    # matmul) in production; this transpose is an extra HBM round-trip.
    return out_t.T                                     # (B, dim), module semantics


def sinusoidal_pos_emb_ref(x: jax.Array, dim: int) -> jax.Array:
    """Pure-JAX reference mirroring the PyTorch forward exactly."""
    half_dim = dim // 2
    emb = math.log(10000.0) / (half_dim - 1)
    emb = jnp.exp(jnp.arange(half_dim, dtype=jnp.float32) * -emb)
    emb = x.astype(jnp.float32)[:, None] * emb[None, :]
    return jnp.concatenate([jnp.sin(emb), jnp.cos(emb)], axis=-1)


if __name__ == "__main__":
    k0, k1, k2 = jax.random.split(jax.random.PRNGKey(0), 3)

    # 1) small batch, small dim (transposed lane-dense path, single grid step)
    B, DIM = 8, 32
    x = jax.random.uniform(k0, (B,), dtype=jnp.float32, minval=0.0, maxval=1000.0)
    out = jax.block_until_ready(sinusoidal_pos_emb(x, DIM))
    ref = sinusoidal_pos_emb_ref(x, DIM)
    assert out.shape == (B, DIM), out.shape
    assert out.dtype == jnp.float32, out.dtype
    assert jnp.allclose(out, ref, atol=1e-5, rtol=1e-5), "mismatch vs reference"

    # 2) larger, non-tile-aligned batch (ragged last block, >=2 grid steps)
    B2 = 300
    x2 = jax.random.uniform(k1, (B2,), dtype=jnp.float32, minval=0.0, maxval=1000.0)
    out2 = jax.block_until_ready(sinusoidal_pos_emb(x2, DIM))
    ref2 = sinusoidal_pos_emb_ref(x2, DIM)
    assert out2.shape == (B2, DIM), out2.shape
    assert jnp.allclose(out2, ref2, atol=1e-5, rtol=1e-5), "mismatch (ragged batch)"

    # 3) lane-aligned dim (direct row-major path, no transpose)
    B3, DIM3 = 320, 256
    x3 = jax.random.uniform(k2, (B3,), dtype=jnp.float32, minval=0.0, maxval=1000.0)
    out3 = jax.block_until_ready(sinusoidal_pos_emb(x3, DIM3))
    ref3 = sinusoidal_pos_emb_ref(x3, DIM3)
    assert out3.shape == (B3, DIM3), out3.shape
    assert jnp.allclose(out3, ref3, atol=1e-5, rtol=1e-5), "mismatch (aligned dim)"

    print("KERNEL_OK")
</pallas_src>

<mosaic_0001>
module attributes {stable_mosaic.version = 11 : i64} {
  func.func @_pos_emb_kernel_dxb(%arg0: i32, %arg1: memref<1x128xf32, #tpu.memory_space<vmem>>, %arg2: memref<16x1xf32, #tpu.memory_space<vmem>>, %arg3: memref<32x128xf32, #tpu.memory_space<vmem>>) attributes {dimension_semantics = [#tpu.dimension_semantics<parallel>], iteration_bounds = array<i64: 1>, scalar_prefetch = 0 : i64, scratch_operands = 0 : i64, tpu.core_type = #tpu.core_type<tc>, window_params = [{transform_indices = @transform_0, window_bounds = array<i64: 1, 128>}, {pipeline_mode = #tpu.pipeline_mode<synchronous>, transform_indices = @transform_1, window_bounds = array<i64: 16, 1>}, {transform_indices = @transform_2, window_bounds = array<i64: 32, 128>}]} {
    %c0 = arith.constant 0 : index
    %c0_0 = arith.constant 0 : index
    %0 = vector.load %arg2[%c0, %c0_0] : memref<16x1xf32, #tpu.memory_space<vmem>>, vector<16x1xf32>
    %c0_1 = arith.constant 0 : index
    %c0_2 = arith.constant 0 : index
    %1 = vector.load %arg1[%c0_1, %c0_2] : memref<1x128xf32, #tpu.memory_space<vmem>>, vector<1x128xf32>
    %2 = vector.broadcast %0 : vector<16x1xf32> to vector<16x128xf32>
    %3 = vector.broadcast %1 : vector<1x128xf32> to vector<16x128xf32>
    %4 = arith.mulf %2, %3 : vector<16x128xf32>
    %5 = math.sin %4 : vector<16x128xf32>
    %c0_3 = arith.constant 0 : index
    %c0_4 = arith.constant 0 : index
    %6 = vector.load %arg3[%c0_3, %c0_4] : memref<32x128xf32, #tpu.memory_space<vmem>>, vector<16x128xf32>
    tpu.vector_store %arg3[%c0_3, %c0_4], %5 {strides = array<i32>} : memref<32x128xf32, #tpu.memory_space<vmem>>, vector<16x128xf32>,
    %7 = math.cos %4 : vector<16x128xf32>
    %c16 = arith.constant 16 : index
    %c0_5 = arith.constant 0 : index
    %8 = vector.load %arg3[%c16, %c0_5] : memref<32x128xf32, #tpu.memory_space<vmem>>, vector<16x128xf32>
    tpu.vector_store %arg3[%c16, %c0_5], %7 {strides = array<i32>} : memref<32x128xf32, #tpu.memory_space<vmem>>, vector<16x128xf32>,
    return
  }
  func.func @transform_0(%arg0: i32) -> (i32, i32) {
    %c0_i32 = arith.constant 0 : i32
    %c0_i32_0 = arith.constant 0 : i32
    return %c0_i32, %arg0 : i32, i32
  }
  func.func @transform_1(%arg0: i32) -> (i32, i32) {
    %c0_i32 = arith.constant 0 : i32
    %c0_i32_0 = arith.constant 0 : i32
    %c0_i32_1 = arith.constant 0 : i32
    return %c0_i32, %c0_i32_0 : i32, i32
  }
  func.func @transform_2(%arg0: i32) -> (i32, i32) {
    %c0_i32 = arith.constant 0 : i32
    %c0_i32_0 = arith.constant 0 : i32
    return %c0_i32, %arg0 : i32, i32
  }
}

</mosaic_0001>

<bundles_post_ra>
// kernel: tpu_custom_call.1
= control target key start
LH: loop header
LB: loop body
LE: loop exit
PB: predicated region body
PF: predicated region fallthrough
CT: control target
= control target key end

     0   :  { %v495_v0 = vmov 0   ;;  %v496_v24 = vmov 683565275   ;;  %v497_v28 = vmov 2475754826   ;;  %s598_s1 = inlined_call_operand.vmem [shape: f32[16,1], index: 1, kind: input, shape index: {}]   ;;  %s599_s0 = inlined_call_operand.vmem [shape: f32[1,8], index: 0, kind: input, shape index: {}]   ;;  %s600_s2 = inlined_call_operand.vmem [shape: f32[32,8], index: 2, kind: output, shape index: {}]  }
   0x1   :  { %486 = vset.pattern.permute.xlu0 %v495_v0  ;;  %v11_v1 = vld [vmem:[%s598_s1] sm:$0xff]  ;;  %v12_v2 = vld [vmem:[%s598_s1 + $0x8] sm:$0xff]  ;;  %v498_v30 = vmov 2131351028   ;;  %v499_v32 = vmov 2102212464  }
   0x2   :  { %16 = vperm.xlu0 %486, %v11_v1   ;;  %v454_v3 = vld [vmem:[%s599_s0] ss:$0 sm:$0xff]  ;;  %v500_v34 = vmov 920167782   ;;  %v501_v41 = vmov 1326507024  }
   0x6   :  { %21 = vperm.xlu0 %486, %v12_v2  }
  0x81   :  { %v17_v4 = vpop.permute.xlu0 %16 }
  0x82   :  { %v526_v5 = vmul.f32 %v454_v3, %v17_v4 }
  0x84   :  { %v32_v6 = vand.u32 2147483647, %v526_v5  ;;  %v35_v7 = vand.u32 2139095040, %v526_v5  ;;  %vm34_vm14 = vcmp.lt.s32.totalorder %v526_v5, 0 }
  0x85   :  { %v22_v8 = vpop.permute.xlu0 %21 }
  0x86   :  { %v36_v9 = vshrl.u32 %v35_v7, 23  ;;  %v530_v10 = vmul.f32 %v454_v3, %v22_v8  ;;  %v39_v11 = vand.u32 8388607, %v32_v6  ;;  %vm33_vm15 = vcmp.le.f32.partialorder %v32_v6, 0.7853982 }
  0x88   :  { %v455_v12 = vadd.s32 4294967169, %v36_v9  ;;  %v139_v13 = vand.u32 2139095040, %v530_v10  ;;  %v40_v15 = vor.u32 8388608, %v39_v11  ;;  %v136_v17 = vand.u32 2147483647, %v530_v10 }
  0x8a   :  { %v42_v14 = vadd.s32 1, %v455_v12  ;;  %v140_v16 = vshrl.u32 %v139_v13, 23  ;;  %v536_v22 = vshll.u32 %v40_v15, 8  ;;  %v143_v26 = vand.u32 8388607, %v136_v17 }
  0x8c   :  { %vm43_vm0 = vcmp.gt.s32.totalorder %v42_v14, 0  ;;  %v459_v19 = vadd.s32 4294967169, %v140_v16  ;;  %v144_v56 = vor.u32 8388608, %v143_v26 }
  0x8d   :  { %v44_v18 = vsel %vm43_vm0, %v42_v14, 0  ;;  %vm138_vm0 = vcmp.lt.s32.totalorder %v530_v10, 0 }
  0x8e   :  { %v45_v20 = vshrl.u32 %v44_v18, 5  ;;  %v46_v21 = vand.u32 31, %v44_v18  ;;  %v146_v27 = vadd.s32 1, %v459_v19  ;;  %v184_v7 = vshll.u32 %v144_v56, 8 }
  0x90   :  { %v47_v23 = vsub.s32 32, %v46_v21  ;;  %v49_v25 = vshll.u32 %v496_v24, %v46_v21  ;;  %v52_v29 = vshll.u32 %v497_v28, %v46_v21  ;;  %v55_v31 = vshll.u32 %v498_v30, %v46_v21 }
  0x91   :  { %v58_v33 = vshll.u32 %v499_v32, %v46_v21  ;;  %v61_v35 = vshll.u32 %v500_v34, %v46_v21  ;;  %vm64_vm1 = vcmp.lt.s32.totalorder %v45_v20, 1  ;;  %vm66_vm2 = vcmp.lt.s32.totalorder %v45_v20, 3 }
  0x92   :  { %v50_v36 = vshrl.u32 %v497_v28, %v47_v23  ;;  %v53_v37 = vshrl.u32 %v498_v30, %v47_v23  ;;  %v56_v38 = vshrl.u32 %v499_v32, %v47_v23  ;;  %v48_v39 = vshrl.u32 %v496_v24, %v47_v23 }
  0x93   :  { %v59_v40 = vshrl.u32 %v500_v34, %v47_v23  ;;  %v62_v42 = vshrl.u32 %v501_v41, %v47_v23  ;;  %vm147_vm3 = vcmp.gt.s32.totalorder %v146_v27, 0  ;;  %vm67_vm4 = vcmp.lt.s32.totalorder %v45_v20, 4 }
  0x94   :  { %v51_v43 = vor.u32 %v50_v36, %v49_v25  ;;  %v54_v44 = vor.u32 %v53_v37, %v52_v29  ;;  %v57_v45 = vor.u32 %v56_v38, %v55_v31  ;;  %v148_v48 = vsel %vm147_vm3, %v146_v27, 0 }
  0x95   :  { %v60_v46 = vor.u32 %v59_v40, %v58_v33  ;;  %v63_v47 = vor.u32 %v62_v42, %v61_v35  ;;  %vm65_vm5 = vcmp.lt.s32.totalorder %v45_v20, 2  ;;  %v150_v59 = vand.u32 31, %v148_v48 }
  0x96   :  { %v68_v49 = vsel %vm64_vm1, %v48_v39, %v51_v43  ;;  %v69_v50 = vsel %vm67_vm4, %v57_v45, 2102212464  ;;  %v72_v51 = vsel %vm64_vm1, %v51_v43, %v54_v44  ;;  %v76_v52 = vsel %vm64_vm1, %v54_v44, %v57_v45 }
  0x97   :  { %v70_v53 = vsel %vm66_vm2, %v54_v44, %v69_v50  ;;  %v73_v54 = vsel %vm67_vm4, %v60_v46, 920167782  ;;  %v77_v55 = vsel %vm67_vm4, %v63_v47, 1326507024  ;;  %v149_v3 = vshrl.u32 %v148_v48, 5 }
  0x98   :  { %v74_v57 = vsel %vm66_vm2, %v57_v45, %v73_v54  ;;  %v78_v58 = vsel %vm66_vm2, %v60_v46, %v77_v55  ;;  %v71_v60 = vsel %vm65_vm5, %v68_v49, %v70_v53  ;;  %v151_v4 = vsub.s32 32, %v150_v59 }
  0x99   :  { %v75_v61 = vsel %vm65_vm5, %v72_v51, %v74_v57  ;;  %v79_v62 = vsel %vm65_vm5, %v76_v52, %v78_v58  ;;  %v87_v8 = vmul.u32 %v536_v22, %v71_v60  ;;  %v153_v9 = vshll.u32 %v496_v24, %v150_v59 }
  0x9a   :  { %v549_v63 = vmul.u32.u64.low %v536_v22, %v79_v62  ;;  %v550_v0 = vmul.u32.u64.high %v536_v22, %v79_v62, %v549_v63  ;;  %v553_v1 = vmul.u32.u64.low %v536_v22, %v75_v61  ;;  %v554_v2 = vmul.u32.u64.high %v536_v22, %v75_v61, %v553_v1 }
  0x9b   :  { %v156_v11 = vshll.u32 %v497_v28, %v150_v59  ;;  %v159_v12 = vshll.u32 %v498_v30, %v150_v59  ;;  %v154_v13 = vshrl.u32 %v497_v28, %v151_v4  ;;  %v157_v14 = vshrl.u32 %v498_v30, %v151_v4 }
  0x9c   :  { %v160_v15 = vshrl.u32 %v499_v32, %v151_v4  ;;  %v162_v16 = vshll.u32 %v499_v32, %v150_v59  ;;  %vm89_vm6 = vc.u32 %v550_v0, %v553_v1  ;;  %v90_v18 = vadd.s32 1, %v554_v2 }
  0x9d   :  { %v163_v19 = vshrl.u32 %v500_v34, %v151_v4  ;;  %v165_v20 = vshll.u32 %v500_v34, %v150_v59  ;;  %v155_v21 = vor.u32 %v154_v13, %v153_v9  ;;  %v158_v23 = vor.u32 %v157_v14, %v156_v11 }
  0x9e   :  { %v161_v25 = vor.u32 %v160_v15, %v159_v12  ;;  %v166_v26 = vshrl.u32 %v501_v41, %v151_v4  ;;  %v91_v22 = vsel %vm89_vm6, %v90_v18, %v554_v2  ;;  %vm168_vm7 = vcmp.lt.s32.totalorder %v149_v3, 1 }
  0x9f   :  { %v164_v27 = vor.u32 %v163_v19, %v162_v16  ;;  %vm171_vm8 = vcmp.lt.s32.totalorder %v149_v3, 4  ;;  %v92_v28 = vadd.s32 %v91_v22, %v87_v8  ;;  %vm170_vm9 = vcmp.lt.s32.totalorder %v149_v3, 3 }
  0xa0   :  { %v167_v29 = vor.u32 %v166_v26, %v165_v20  ;;  %v173_v30 = vsel %vm171_vm8, %v161_v25, 2102212464  ;;  %v152_v31 = vshrl.u32 %v496_v24, %v151_v4  ;;  %v176_v32 = vsel %vm168_vm7, %v155_v21, %v158_v23 }
  0xa1   :  { %v177_v33 = vsel %vm171_vm8, %v164_v27, 920167782  ;;  %v180_v35 = vsel %vm168_vm7, %v158_v23, %v161_v25  ;;  %v93_v36 = vadd.s32 536870912, %v92_v28  ;;  %vm169_vm10 = vcmp.lt.s32.totalorder %v149_v3, 2 }
  0xa2   :  { %v178_v34 = vsel %vm170_vm9, %v161_v25, %v177_v33  ;;  %v181_v37 = vsel %vm171_vm8, %v167_v29, 1326507024  ;;  %v172_v38 = vsel %vm168_vm7, %v152_v31, %v155_v21  ;;  %v174_v39 = vsel %vm170_vm9, %v158_v23, %v173_v30 }
  0xa3   :  { %v179_v40 = vsel %vm169_vm10, %v176_v32, %v178_v34  ;;  %v182_v41 = vsel %vm170_vm9, %v164_v27, %v181_v37  ;;  %v94_v42 = vshrl.u32 %v93_v36, 30  ;;  %v175_v48 = vsel %vm169_vm10, %v172_v38, %v174_v39 }
  0xa4   :  { %v183_v43 = vsel %vm169_vm10, %v180_v35, %v182_v41  ;;  %v564_v44 = vmul.u32.u64.low %v184_v7, %v179_v40  ;;  %v565_v45 = vmul.u32.u64.high %v184_v7, %v179_v40, %v564_v44  ;;  %v191_v51 = vmul.u32 %v184_v7, %v175_v48 }
  0xa5   :  { %v567_v46 = vmul.u32.u64.low %v184_v7, %v183_v43  ;;  %v568_v47 = vmul.u32.u64.high %v184_v7, %v183_v43, %v567_v46  ;;  %v95_v24 = vshll.u32 %v94_v42, 30  ;;  %v88_v63 = vadd.s32 %v553_v1, %v550_v0 }
  0xa6   :  { %v194_v50 = vadd.s32 1, %v565_v45  ;;  %v118_v21 = vsub.s32 4, %v94_v42  ;;  %vm137_vm1 = vcmp.le.f32.partialorder %v136_v17, 0.7853982  ;;  %vm124_vm8 = vweird.f32 %v526_v5 }
  0xa7   :  { %v96_v49 = vsub.s32 %v92_v28, %v95_v24  ;;  %vm193_vm11 = vc.u32 %v568_v47, %v564_v44  ;;  %v192_v0 = vadd.s32 %v564_v44, %v568_v47 }
  0xa8   :  { %v195_v53 = vsel %vm193_vm11, %v194_v50, %v565_v45  ;;  %v119_v30 = vsel %vm34_vm14, %v118_v21, %v94_v42 }
  0xa9   :  { %v98_v52 = vsub.s32 0, %v96_v49  ;;  %v196_v54 = vadd.s32 %v195_v53, %v191_v51  ;;  %v121_v35 = vsel %vm33_vm15, 0, %v119_v30 }
  0xaa   :  { %v125_v38 = vadd.s32 3, %v121_v35  ;;  %v335_v41 = vand.u32 3, %v121_v35 }
  0xab   :  { %v456_v55 = vmin.u32 %v98_v52, %v96_v49  ;;  %v197_v56 = vadd.s32 536870912, %v196_v54 }
  0xac   :  { %v126_v44 = vand.u32 3, %v125_v38  ;;  %vm340_vm2 = vcmp.eq.s32.totalorder %v335_v41, 2  ;;  %vm337_vm5 = vcmp.eq.s32.totalorder %v335_v41, 0  ;;  %vm336_vm7 = vcmp.lt.s32.totalorder %v335_v41, 2 }
  0xad   :  { %v100_v57 = vclz %v456_v55  ;;  %v198_v58 = vshrl.u32 %v197_v56, 30 }
  0xae   :  { %vm131_vm3 = vcmp.eq.s32.totalorder %v126_v44, 2  ;;  %vm128_vm4 = vcmp.eq.s32.totalorder %v126_v44, 0  ;;  %vm127_vm6 = vcmp.lt.s32.totalorder %v126_v44, 2 }
  0xaf   :  { %v457_v59 = vadd.s32 4294967294, %v100_v57  ;;  %v199_v60 = vshll.u32 %v198_v58, 30  ;;  %v222_v40 = vsub.s32 4, %v198_v58 }
  0xb1   :  { %vm458_vm12 = vcmp.lt.s32.totalorder %v457_v59, 0  ;;  %v200_v62 = vsub.s32 %v196_v54, %v199_v60  ;;  %v223_v42 = vsel %vm138_vm0, %v222_v40, %v198_v58 }
  0xb2   :  { %v103_v61 = vsel %vm458_vm12, 0, %v457_v59 }
  0xb3   :  { %v104_v2 = vsub.s32 32, %v103_v61  ;;  %v108_v3 = vsub.s32 4294967266, %v103_v61  ;;  %v202_v4 = vsub.s32 0, %v200_v62  ;;  %v105_v7 = vshll.u32 %v96_v49, %v103_v61 }
  0xb4   :  { %v225_v49 = vsel %vm137_vm1, 0, %v223_v42 }
  0xb5   :  { %v106_v8 = vshrl.u32 %v88_v63, %v104_v2  ;;  %v109_v9 = vadd.s32 127, %v108_v3  ;;  %v460_v11 = vmin.u32 %v202_v4, %v200_v62  ;;  %v229_v55 = vadd.s32 3, %v225_v49 }
  0xb6   :  { %v438_v59 = vand.u32 3, %v225_v49 }
  0xb7   :  { %v107_v12 = vor.u32 %v106_v8, %v105_v7  ;;  %v110_v13 = vshll.u32 %v109_v9, 23  ;;  %v204_v14 = vclz %v460_v11  ;;  %v230_v58 = vand.u32 3, %v229_v55 }
  0xb8   :  { %vm443_vm10 = vcmp.eq.s32.totalorder %v438_v59, 2  ;;  %vm440_vm12 = vcmp.eq.s32.totalorder %v438_v59, 0 }
  0xb9   :  { %v111_v15 = vor.u32 4788187, %v110_v13  ;;  %v461_v16 = vadd.s32 4294967294, %v204_v14  ;;  %v114_v19 = vcvt.s32.f32 %v107_v12  ;;  %vm235_vm9 = vcmp.eq.s32.totalorder %v230_v58, 2 }
  0xba   :  { %vm232_vm11 = vcmp.eq.s32.totalorder %v230_v58, 0 }
  0xbb   :  { %v112_v18 = vand.u32 2147483647, %v111_v15  ;;  %vm462_vm13 = vcmp.lt.s32.totalorder %v461_v16, 0 }
  0xbc   :  { %v207_v23 = vsel %vm462_vm13, 0, %v461_v16  ;;  %vm231_vm13 = vcmp.lt.s32.totalorder %v230_v58, 2 }
  0xbd   :  { %v115_v20 = vmul.f32 %v114_v19, %v112_v18  ;;  %v208_v1 = vsub.s32 32, %v207_v23  ;;  %v212_v25 = vsub.s32 4294967266, %v207_v23  ;;  %v209_v22 = vshll.u32 %v200_v62, %v207_v23 }
  0xbf   :  { %v116_v26 = vxor.u32 2147483648, %v115_v20  ;;  %v210_v27 = vshrl.u32 %v192_v0, %v208_v1  ;;  %v213_v28 = vadd.s32 127, %v212_v25 }
  0xc1   :  { %v117_v29 = vsel %vm34_vm14, %v116_v26, %v115_v20  ;;  %v211_v32 = vor.u32 %v210_v27, %v209_v22  ;;  %v214_v33 = vshll.u32 %v213_v28, 23  ;;  %vm439_vm14 = vcmp.lt.s32.totalorder %v438_v59, 2 }
  0xc2   :  { %v120_v31 = vsel %vm33_vm15, %v526_v5, %v117_v29  ;;  %vm228_vm15 = vweird.f32 %v530_v10 }
  0xc3   :  { %487 = vcosq.f32 %v120_v31  ;;  %v215_v36 = vor.u32 4788187, %v214_v33  ;;  %v218_v37 = vcvt.s32.f32 %v211_v32 }
  0xc4   :  { %489 = vsinq.f32 %v120_v31 }
  0xc5   :  { %v216_v34 = vand.u32 2147483647, %v215_v36 }
  0xc7   :  { %v219_v39 = vmul.f32 %v218_v37, %v216_v34 }
  0xc9   :  { %v220_v43 = vxor.u32 2147483648, %v219_v39 }
  0xcb   :  { %v221_v6 = vsel %vm138_vm0, %v220_v43, %v219_v39 }
  0xcc   :  { %v224_v46 = vsel %vm137_vm1, %v530_v10, %v221_v6 }
  0xcd   :  { %v488_v45 = vpop.eup %487  ;;  %491 = vcosq.f32 %v224_v46 }
  0xce   :  { %v490_v47 = vpop.eup %489  ;;  %v132_v24 = vxor.u32 2147483648, %v488_v45  ;;  %493 = vsinq.f32 %v224_v46 }
  0xcf   :  { %v129_v48 = vxor.u32 2147483648, %v490_v47 }
  0xd0   :  { %v133_v50 = vsel %vm131_vm3, %v132_v24, %v490_v47  ;;  %v342_v51 = vsel %vm340_vm2, %v132_v24, %v490_v47 }
  0xd1   :  { %v130_v52 = vsel %vm128_vm4, %v488_v45, %v129_v48  ;;  %v339_v17 = vsel %vm337_vm5, %v488_v45, %v129_v48 }
  0xd2   :  { %v134_v53 = vsel %vm127_vm6, %v130_v52, %v133_v50  ;;  %v343_v54 = vsel %vm336_vm7, %v339_v17, %v342_v51 }
  0xd3   :  { %v135_v56 = vsel %vm124_vm8, nan, %v134_v53  ;;  %v344_v57 = vsel %vm124_vm8, nan, %v343_v54 }
  0xd4   :  { %240 = vst [vmem:[%s600_s2] sm:$0xff] %v135_v56  ;;  %448 = vst [vmem:[%s600_s2 + $0x10] sm:$0xff] %v344_v57 }
  0xd7   :  { %v492_v60 = vpop.eup %491 }
  0xd8   :  { %v494_v61 = vpop.eup %493  ;;  %v236_v62 = vxor.u32 2147483648, %v492_v60 }
  0xd9   :  { %v233_v63 = vxor.u32 2147483648, %v494_v61 }
  0xda   :  { %v237_v5 = vsel %vm235_vm9, %v236_v62, %v494_v61  ;;  %v445_v2 = vsel %vm443_vm10, %v236_v62, %v494_v61 }
  0xdb   :  { %v234_v3 = vsel %vm232_vm11, %v492_v60, %v233_v63  ;;  %v442_v4 = vsel %vm440_vm12, %v492_v60, %v233_v63 }
  0xdc   :  { %v238_v7 = vsel %vm231_vm13, %v234_v3, %v237_v5  ;;  %v446_v8 = vsel %vm439_vm14, %v442_v4, %v445_v2 }
  0xdd   :  { %v239_v9 = vsel %vm228_vm15, nan, %v238_v7  ;;  %v447_v11 = vsel %vm228_vm15, nan, %v446_v8 }
  0xde   :  { %241 = vst [vmem:[%s600_s2 + $0x8] sm:$0xff] %v239_v9  ;;  %449 = vst [vmem:[%s600_s2 + $0x18] sm:$0xff] %v447_v11 }

</bundles_post_ra>
